<compile_context>
chip_gen: v7x
topology: tpu7x:2x2x1
jax: 0.10.0
libtpu: 0.0.40
codegen_flags: <defaults>
</compile_context>

<pallas_src>
import functools

import jax
import jax.numpy as jnp
from jax.experimental import pallas as pl
from jax.experimental.pallas import tpu as pltpu


def linear_kernel(x_ref, wt_ref, b_ref, o_ref):
    """out = x @ wt + b with the tiny K=3 contraction unrolled as VPU FMAs.

    x_ref : (tm, Din)   activation tile
    wt_ref: (Din, Dout) pre-transposed weight (resident across grid steps)
    b_ref : (1, Dout)   bias (resident across grid steps)
    """
    x = x_ref[...]                       # (tm, Din) f32
    wt = wt_ref[...]                     # (Din, Dout) f32
    din = wt.shape[0]
    # Fold the bias add into the accumulator init.
    acc = jnp.broadcast_to(
        b_ref[...].astype(jnp.float32), (x.shape[0], wt.shape[1])
    )
    # Din is tiny (3): three broadcast multiply-adds on the VPU instead of a
    # <0.1%-utilization MXU matmul (frees the vector-extended slot entirely).
    for k in range(din):
        acc = acc + x[:, k:k + 1].astype(jnp.float32) * wt[k:k + 1, :].astype(
            jnp.float32
        )
    o_ref[...] = acc.astype(o_ref.dtype)


def linear_pallas(x, weight, bias, *, batch_tile=512):
    """x: (B, Din), weight: (Dout, Din) (PyTorch convention), bias: (Dout,)."""
    B, Din = x.shape
    Dout = weight.shape[0]
    wt = jnp.asarray(weight).T               # (Din, Dout) so kernel is row-major
    b2 = jnp.asarray(bias).reshape(1, Dout)  # 2-D for TPU-friendly layout

    if B >= batch_tile and B % batch_tile == 0:
        # Large-batch path: tile only the batch axis; weight/bias stay resident
        # in VMEM across all grid steps (index_map always returns block (0, 0)).
        tm = batch_tile
        return pl.pallas_call(
            linear_kernel,
            out_shape=jax.ShapeDtypeStruct((B, Dout), x.dtype),
            grid=(B // tm,),
            in_specs=[
                pl.BlockSpec((tm, Din), lambda i: (i, 0)),
                pl.BlockSpec((Din, Dout), lambda i: (0, 0)),
                pl.BlockSpec((1, Dout), lambda i: (0, 0)),
            ],
            out_specs=pl.BlockSpec((tm, Dout), lambda i: (i, 0)),
            compiler_params=pltpu.CompilerParams(
                dimension_semantics=("parallel",),
            ),
        )(x, wt, b2)

    # Small-batch path: whole problem is a single tile -> no grid, no per-step
    # pipeline overhead; all operands live in VMEM for the single invocation.
    vmem_spec = functools.partial(
        pl.BlockSpec, memory_space=pltpu.MemorySpace.VMEM
    )
    return pl.pallas_call(
        linear_kernel,
        out_shape=jax.ShapeDtypeStruct((B, Dout), x.dtype),
        in_specs=[vmem_spec(), vmem_spec(), vmem_spec()],
        out_specs=vmem_spec(),
    )(x, wt, b2)


if __name__ == "__main__":
    key = jax.random.PRNGKey(0)
    kx, kw, kb, kx2 = jax.random.split(key, 4)

    # Module: Linear(3, 3). Small batch consistent with the forward.
    B, Din, Dout = 8, 3, 3
    x = jax.random.normal(kx, (B, Din), dtype=jnp.float32)

    # Deterministic parameter init (synthetic; mimics PyTorch's uniform range).
    bound = 1.0 / (Din ** 0.5)
    weight = jax.random.uniform(kw, (Dout, Din), jnp.float32, -bound, bound)
    bias = jax.random.uniform(kb, (Dout,), jnp.float32, -bound, bound)

    # Gridless single-tile path.
    out = linear_pallas(x, weight, bias)
    jax.block_until_ready(out)
    ref = x @ weight.T + bias
    assert out.shape == (B, Dout)
    assert jnp.allclose(out, ref, atol=1e-5, rtol=1e-5)

    # Also exercise the batch-tiled "parallel" path once.
    B2 = 1024
    x2 = jax.random.normal(kx2, (B2, Din), dtype=jnp.float32)
    out2 = linear_pallas(x2, weight, bias)
    jax.block_until_ready(out2)
    ref2 = x2 @ weight.T + bias
    assert out2.shape == (B2, Dout)
    assert jnp.allclose(out2, ref2, atol=1e-5, rtol=1e-5)

    print("KERNEL_OK")
</pallas_src>

<mosaic_0001>
module attributes {stable_mosaic.version = 11 : i64} {
  func.func @linear_kernel(%arg0: memref<8x3xf32, #tpu.memory_space<vmem>>, %arg1: memref<3x3xf32, #tpu.memory_space<vmem>>, %arg2: memref<1x3xf32, #tpu.memory_space<vmem>>, %arg3: memref<8x3xf32, #tpu.memory_space<vmem>>) attributes {dimension_semantics = [], scalar_prefetch = 0 : i64, scratch_operands = 0 : i64, tpu.core_type = #tpu.core_type<tc>} {
    %c0 = arith.constant 0 : index
    %c0_0 = arith.constant 0 : index
    %0 = vector.load %arg0[%c0, %c0_0] : memref<8x3xf32, #tpu.memory_space<vmem>>, vector<8x3xf32>
    %c0_1 = arith.constant 0 : index
    %c0_2 = arith.constant 0 : index
    %1 = vector.load %arg1[%c0_1, %c0_2] : memref<3x3xf32, #tpu.memory_space<vmem>>, vector<3x3xf32>
    %c0_3 = arith.constant 0 : index
    %c0_4 = arith.constant 0 : index
    %2 = vector.load %arg2[%c0_3, %c0_4] : memref<1x3xf32, #tpu.memory_space<vmem>>, vector<1x3xf32>
    %3 = vector.shape_cast %2 : vector<1x3xf32> to vector<1x3xf32>
    %4 = vector.broadcast %3 : vector<1x3xf32> to vector<8x3xf32>
    %5 = vector.extract_strided_slice %0 {offsets = [0, 0], sizes = [8, 1], strides = [1, 1]} : vector<8x3xf32> to vector<8x1xf32>
    %6 = vector.extract_strided_slice %1 {offsets = [0, 0], sizes = [1, 3], strides = [1, 1]} : vector<3x3xf32> to vector<1x3xf32>
    %7 = vector.broadcast %5 : vector<8x1xf32> to vector<8x3xf32>
    %8 = vector.broadcast %6 : vector<1x3xf32> to vector<8x3xf32>
    %9 = arith.mulf %7, %8 : vector<8x3xf32>
    %10 = arith.addf %4, %9 : vector<8x3xf32>
    %11 = vector.extract_strided_slice %0 {offsets = [0, 1], sizes = [8, 1], strides = [1, 1]} : vector<8x3xf32> to vector<8x1xf32>
    %12 = vector.extract_strided_slice %1 {offsets = [1, 0], sizes = [1, 3], strides = [1, 1]} : vector<3x3xf32> to vector<1x3xf32>
    %13 = vector.broadcast %11 : vector<8x1xf32> to vector<8x3xf32>
    %14 = vector.broadcast %12 : vector<1x3xf32> to vector<8x3xf32>
    %15 = arith.mulf %13, %14 : vector<8x3xf32>
    %16 = arith.addf %10, %15 : vector<8x3xf32>
    %17 = vector.extract_strided_slice %0 {offsets = [0, 2], sizes = [8, 1], strides = [1, 1]} : vector<8x3xf32> to vector<8x1xf32>
    %18 = vector.extract_strided_slice %1 {offsets = [2, 0], sizes = [1, 3], strides = [1, 1]} : vector<3x3xf32> to vector<1x3xf32>
    %19 = vector.broadcast %17 : vector<8x1xf32> to vector<8x3xf32>
    %20 = vector.broadcast %18 : vector<1x3xf32> to vector<8x3xf32>
    %21 = arith.mulf %19, %20 : vector<8x3xf32>
    %22 = arith.addf %16, %21 : vector<8x3xf32>
    %c0_5 = arith.constant 0 : index
    %c0_6 = arith.constant 0 : index
    %23 = vector.load %arg3[%c0_5, %c0_6] : memref<8x3xf32, #tpu.memory_space<vmem>>, vector<8x3xf32>
    tpu.vector_store %arg3[%c0_5, %c0_6], %22 {strides = array<i32>} : memref<8x3xf32, #tpu.memory_space<vmem>>, vector<8x3xf32>,
    return
  }
}

</mosaic_0001>

<bundles_post_ra>
// kernel: tpu_custom_call.1
= control target key start
LH: loop header
LB: loop body
LE: loop exit
PB: predicated region body
PF: predicated region fallthrough
CT: control target
= control target key end

     0   :  { %v68_v0 = vmov 0   ;;  %v69_v2 = vmov 2   ;;  %v70_v3 = vmov 1   ;;  %v28_v4 = vlaneseq  ;;  %s103_s0 = inlined_call_operand.vmem [shape: f32[8,3], index: 0, kind: input, shape index: {}]   ;;  %s104_s1 = inlined_call_operand.vmem [shape: f32[3,3], index: 1, kind: input, shape index: {}]   ;;  %s105_s2 = inlined_call_operand.vmem [shape: f32[1,3], index: 2, kind: input, shape index: {}]   ;;  %s106_s3 = inlined_call_operand.vmem [shape: f32[8,3], index: 3, kind: output, shape index: {}]  }
   0x1   :  { %64 = vset.pattern.permute.xlu0 %v68_v0  ;;  %v14_v1 = vld [vmem:[%s103_s0] sm:$0xff]  ;;  %66 = vset.pattern.permute.xlu1 %v69_v2  ;;  %vm54_vm0 = vcmask 23552  }
   0x2   :  { %25 = vperm.xlu0 %64, %v14_v1   ;;  %45 = vperm.xlu1 %66, %v14_v1   ;;  %v29_v5 = vshrl.u32 %v28_v4, 7  ;;  %v15_v7 = vld [vmem:[%s104_s1] sm:$0x7] }
   0x3   :  { %v60_v15 = vld [vmem:[%s105_s2] ss:$0 sm:$0xff] }
   0x4   :  { %v30_v6 = vsub.s32 0, %v29_v5  ;;  %v40_v9 = vsub.s32 1, %v29_v5  ;;  %v50_v10 = vsub.s32 2, %v29_v5 }
   0x6   :  { %65 = vset.pattern.permute.xlu0 %v70_v3  ;;  %v31_v8 = vrot.slane %v15_v7, %v30_v6  ;;  %v41_v13 = vrot.slane %v15_v7, %v40_v9  ;;  %v51_v14 = vrot.slane %v15_v7, %v50_v10 }
   0x7   :  { %35 = vperm.xlu0 %65, %v14_v1  }
   0xb   :  { %67 = vset.pattern.permute.xlu0 %v69_v2 }
  0x81   :  { %v26_v11 = vpop.permute.xlu0 %25  ;;  %v46_v16 = vpop.permute.xlu1 %45 }
  0x82   :  { %v32_v12 = vmul.f32 %v31_v8, %v26_v11  ;;  %v52_v20 = vmul.f32 %v51_v14, %v46_v16 }
  0x84   :  { %v33_v18 = vadd.f32 %v60_v15, %v32_v12 }
  0x86   :  { %v36_v17 = vpop.permute.xlu0 %35 }
  0x87   :  { %v42_v19 = vmul.f32 %v41_v13, %v36_v17 }
  0x89   :  { %v43_v21 = vadd.f32 %v42_v19, %v33_v18 }
  0x8b   :  { %v53_v22 = vadd.f32 %v52_v20, %v43_v21 }
  0x8d   :  { %55 = vst.msk [vmem:[%s106_s3] sm:$0xff] %vm54_vm0, %v53_v22 }

</bundles_post_ra>
